<compile_context>
chip_gen: v7x
topology: tpu7x:2x2x1
jax: 0.10.0
libtpu: 0.0.40
codegen_flags: <defaults>
</compile_context>

<pallas_src>
from functools import partial

import jax
import jax.numpy as jnp
from jax import lax
from jax.experimental import pallas as pl
from jax.experimental.pallas import tpu as pltpu


def _round_up(v, m):
    return ((v + m - 1) // m) * m


def _make_kernel(N, Cin, Cout, K, L, pool, Mmax, Lq, Lout, P, eps):
    LN = L * N
    LQN = Lq * N
    RO = pool * Cout                      # deconv matmul rows, indexed (r, o)
    rmin = K - pool * (Mmax - 1)          # first phase r that is out-of-range at q = Lq-1

    def rep_rows(v):                      # (Cout, 1) -> (pool*Cout, 1), row index (r, o)
        return v if pool == 1 else jnp.concatenate([v] * pool, axis=0)

    def kernel(x_ref, w1_ref, w2_ref, p_ref, out_ref):
        cb, db = p_ref[:, 0:1], p_ref[:, 1:2]            # (Cout, 1)
        gamma, beta = p_ref[:, 2:3], p_ref[:, 3:4]

        # ----- stage 1: Conv1d('same') on the MXU, BN(batch stats) + ReLU on VPU -----
        x = x_ref[...]                                    # (Cin, (L+K-1)*N), cols = (lx, n)
        taps = jnp.concatenate(                           # rows (k, c), cols (l, n)
            [x[:, k * N:k * N + LN] for k in range(K)], axis=0)
        c_pre = jnp.dot(w1_ref[...], taps,
                        preferred_element_type=jnp.float32) + cb        # (Cout, L*N) f32
        inv1 = 1.0 / float(N * L)
        mean1 = jnp.sum(c_pre, axis=1, keepdims=True) * inv1
        cen1 = c_pre - mean1
        var1 = jnp.sum(cen1 * cen1, axis=1, keepdims=True) * inv1        # centered (two-pass)
        a = jnp.maximum(cen1 * lax.rsqrt(var1 + eps) * gamma + beta, 0.0)
        a16 = a.astype(jnp.bfloat16)                      # bf16 MXU operand, f32 accumulation

        # ----- stage 2: ConvTranspose1d as a phase-decomposed MXU matmul -----
        # tap m is `a` delayed by m time steps (zero filled); rows (m, c), cols (q, n).
        def tap(m):
            lpad, rpad = m * N, (Lq - L - m) * N
            pieces = []
            if lpad:
                pieces.append(jnp.zeros((Cout, lpad), jnp.bfloat16))
            pieces.append(a16)
            if rpad:
                pieces.append(jnp.zeros((Cout, rpad), jnp.bfloat16))
            return pieces[0] if len(pieces) == 1 else jnp.concatenate(pieces, axis=1)

        taps2 = (tap(0) if Mmax == 1
                 else jnp.concatenate([tap(m) for m in range(Mmax)], axis=0))
        z = jnp.dot(w2_ref[...], taps2,
                    preferred_element_type=jnp.float32) + rep_rows(db)   # (RO, Lq*N) f32

        # valid deconv positions: t = pool*q + r < Lout.  Only the last q-column block
        # can be invalid, and only for phases r >= rmin  (no integer division needed).
        col_i = lax.broadcasted_iota(jnp.int32, (RO, LQN), 1)
        row_i = lax.broadcasted_iota(jnp.int32, (RO, LQN), 0)
        invalid = (col_i >= (Lq - 1) * N) & (row_i >= rmin * Cout)
        mask = jnp.where(invalid, 0.0, 1.0)

        # BN2 statistics over (batch, valid time) per output channel o: fold the `pool`
        # phase row-blocks, then one lane reduction per statistic (two-pass variance).
        inv2 = 1.0 / float(N * Lout)
        zm = z * mask
        s = zm[:Cout, :]
        for r in range(1, pool):
            s = s + zm[r * Cout:(r + 1) * Cout, :]
        mean2 = jnp.sum(s, axis=1, keepdims=True) * inv2                 # (Cout, 1)
        mean2_ro = rep_rows(mean2)
        cen2 = (z - mean2_ro) * mask
        ss = cen2[:Cout, :] * cen2[:Cout, :]
        for r in range(1, pool):
            blk = cen2[r * Cout:(r + 1) * Cout, :]
            ss = ss + blk * blk
        var2 = jnp.sum(ss, axis=1, keepdims=True) * inv2                 # (Cout, 1)
        scale = rep_rows(lax.rsqrt(var2 + eps) * gamma)
        shift = rep_rows(beta)
        y = jnp.maximum((z - mean2_ro) * scale + shift, 0.0)             # (RO, Lq*N)

        # single lane-dense (unmasked) store of the whole phase-domain result
        if P > LQN:
            y = jnp.concatenate([y, jnp.zeros((RO, P - LQN), jnp.float32)], axis=1)
        out_ref[...] = y

    return kernel


@partial(jax.jit, static_argnames=("kernel_size", "pool", "eps"))
def conv_then_deconv_then_concat(leftskip, x, params, *, kernel_size=7, pool=4, eps=1e-5):
    cw = params["conv_w"].astype(jnp.float32)      # (Cout, Cin, K)
    cb = params["conv_b"].astype(jnp.float32)      # (Cout,)
    dw = params["deconv_w"].astype(jnp.float32)    # (Cout_in, Cout_out, K)
    db = params["deconv_b"].astype(jnp.float32)    # (Cout,)
    gamma = params["bn_gamma"].astype(jnp.float32)
    beta = params["bn_beta"].astype(jnp.float32)

    N, Cin, L = x.shape
    Cout, _, K = cw.shape
    assert K == kernel_size
    Mmax = -(-K // pool)                  # taps per phase = ceil(K / pool)
    Lq = L + Mmax - 1                     # phase-domain length
    Lout = (L - 1) * pool + K             # ConvTranspose1d output length
    P = _round_up(Lq * N, 128)            # lane-dense output width
    Cskip = leftskip.shape[1]
    assert leftskip.shape == (N, Cskip, Lout)

    # --- input: 'same' padding, then time-major / batch-minor flattening -------------
    left = (K - 1) // 2
    xp = jnp.pad(x.astype(jnp.float32), ((0, 0), (0, 0), (left, K - 1 - left)))
    X = xp.transpose(1, 2, 0).reshape(Cin, (L + K - 1) * N)          # X[c, lx*N + n]

    # --- conv weight as (Cout, K*Cin); rows match the in-kernel tap order (k, c) -----
    W1 = cw.transpose(0, 2, 1).reshape(Cout, K * Cin)

    # --- phase-decomposed deconv weights: W2[r*Cout+o, m*Cout+c] = dw[c,o,pool*m+r] ---
    kk = pool * jnp.arange(Mmax)[None, :] + jnp.arange(pool)[:, None]   # (pool, Mmax)
    sub = dw[:, :, jnp.clip(kk, 0, K - 1)]                              # (C, C, pool, Mmax)
    sub = jnp.where((kk < K)[None, None], sub, 0.0)
    W2 = sub.transpose(2, 1, 3, 0).reshape(pool * Cout, Mmax * Cout).astype(jnp.bfloat16)

    # --- per-channel params packed into one operand (one DMA instead of five) --------
    pparams = jnp.stack([cb, db, gamma, beta], axis=1)                  # (Cout, 4)

    kernel = _make_kernel(N, Cin, Cout, K, L, pool, Mmax, Lq, Lout, P, eps)
    vmem = pl.BlockSpec(memory_space=pltpu.MemorySpace.VMEM)
    slab = pl.pallas_call(
        kernel,
        out_shape=jax.ShapeDtypeStruct((pool * Cout, P), jnp.float32),
        in_specs=[vmem, vmem, vmem, vmem],
        out_specs=vmem,
    )(X, W1, W2, pparams)

    # phase interleave (r, o, q, n) -> (n, o, t = q*pool + r), slice to Lout, concat.
    z = slab[:, :Lq * N].reshape(pool, Cout, Lq, N)
    deconved = z.transpose(3, 1, 2, 0).reshape(N, Cout, Lq * pool)[:, :, :Lout]
    return jnp.concatenate([leftskip.astype(jnp.float32), deconved], axis=1)


def reference(leftskip, x, params, *, kernel_size=7, pool=4, eps=1e-5):
    """Pure-JAX (lax.conv, f32 HIGHEST) reference for the PyTorch forward pass."""
    cw, cb = params["conv_w"], params["conv_b"]
    dw, db = params["deconv_w"], params["deconv_b"]
    gamma, beta = params["bn_gamma"], params["bn_beta"]
    K = kernel_size
    left = (K - 1) // 2
    right = (K - 1) - left

    def bn_relu(z):
        m = jnp.mean(z, axis=(0, 2), keepdims=True)
        v = jnp.mean((z - m) ** 2, axis=(0, 2), keepdims=True)
        y = (z - m) * lax.rsqrt(v + eps) * gamma[None, :, None] + beta[None, :, None]
        return jnp.maximum(y, 0.0)

    conv = lax.conv_general_dilated(
        x, cw, window_strides=(1,), padding=[(left, right)],
        dimension_numbers=("NCH", "OIH", "NCH"),
        precision=lax.Precision.HIGHEST) + cb[None, :, None]
    a = bn_relu(conv)

    # ConvTranspose1d == lhs-dilated conv with flipped, transposed kernel
    w_t = jnp.flip(dw, axis=-1).transpose(1, 0, 2)   # (out, in, K)
    de = lax.conv_general_dilated(
        a, w_t, window_strides=(1,), padding=[(K - 1, K - 1)], lhs_dilation=(pool,),
        dimension_numbers=("NCH", "OIH", "NCH"),
        precision=lax.Precision.HIGHEST) + db[None, :, None]
    d = bn_relu(de)
    return jnp.concatenate([leftskip, d], axis=1)


if __name__ == "__main__":
    N, Cin, Cout, K, pool, L = 2, 1, 2, 7, 4, 16
    Lout = (L - 1) * pool + K            # 67
    Cskip = Cout                         # skip connection carries out_filters channels

    key = jax.random.PRNGKey(0)
    ks = jax.random.split(key, 8)
    params = dict(
        conv_w=0.3 * jax.random.normal(ks[0], (Cout, Cin, K), jnp.float32),
        conv_b=0.1 * jax.random.normal(ks[1], (Cout,), jnp.float32),
        deconv_w=0.3 * jax.random.normal(ks[2], (Cout, Cout, K), jnp.float32),
        deconv_b=0.1 * jax.random.normal(ks[3], (Cout,), jnp.float32),
        bn_gamma=1.0 + 0.1 * jax.random.normal(ks[4], (Cout,), jnp.float32),
        bn_beta=0.1 * jax.random.normal(ks[5], (Cout,), jnp.float32),
    )
    x = jax.random.normal(ks[6], (N, Cin, L), jnp.float32)
    leftskip = jax.random.normal(ks[7], (N, Cskip, Lout), jnp.float32)

    out = conv_then_deconv_then_concat(leftskip, x, params)
    out = jax.block_until_ready(out)

    ref = reference(leftskip, x, params)
    assert out.shape == (N, Cskip + Cout, Lout), out.shape
    # Deconv matmul operands are bf16 on the MXU (f32 accumulation / BN stats),
    # so the tolerance vs. the f32 HIGHEST reference is set accordingly.
    if not jnp.allclose(out, ref, atol=2e-2, rtol=2e-2):
        max_err = float(jnp.max(jnp.abs(out - ref)))
        raise AssertionError(f"Pallas kernel mismatch vs reference (max abs err {max_err})")
    print("KERNEL_OK")
</pallas_src>

<mosaic_0001>
module attributes {stable_mosaic.version = 11 : i64} {
  func.func @kernel(%arg0: memref<1x44xf32, #tpu.memory_space<vmem>>, %arg1: memref<2x7xf32, #tpu.memory_space<vmem>>, %arg2: memref<8x4xbf16, #tpu.memory_space<vmem>>, %arg3: memref<2x4xf32, #tpu.memory_space<vmem>>, %arg4: memref<8x128xf32, #tpu.memory_space<vmem>>) attributes {dimension_semantics = [], scalar_prefetch = 0 : i64, scratch_operands = 0 : i64, tpu.core_type = #tpu.core_type<tc>} {
    %c0 = arith.constant 0 : index
    %c0_0 = arith.constant 0 : index
    %0 = vector.load %arg3[%c0, %c0_0] : memref<2x4xf32, #tpu.memory_space<vmem>>, vector<2x1xf32>
    %c0_1 = arith.constant 0 : index
    %c1 = arith.constant 1 : index
    %1 = vector.load %arg3[%c0_1, %c1] : memref<2x4xf32, #tpu.memory_space<vmem>>, vector<2x1xf32>
    %c0_2 = arith.constant 0 : index
    %c2 = arith.constant 2 : index
    %2 = vector.load %arg3[%c0_2, %c2] : memref<2x4xf32, #tpu.memory_space<vmem>>, vector<2x1xf32>
    %c0_3 = arith.constant 0 : index
    %c3 = arith.constant 3 : index
    %3 = vector.load %arg3[%c0_3, %c3] : memref<2x4xf32, #tpu.memory_space<vmem>>, vector<2x1xf32>
    %c0_4 = arith.constant 0 : index
    %c0_5 = arith.constant 0 : index
    %4 = vector.load %arg0[%c0_4, %c0_5] : memref<1x44xf32, #tpu.memory_space<vmem>>, vector<1x44xf32>
    %5 = vector.extract_strided_slice %4 {offsets = [0, 0], sizes = [1, 32], strides = [1, 1]} : vector<1x44xf32> to vector<1x32xf32>
    %6 = vector.extract_strided_slice %4 {offsets = [0, 2], sizes = [1, 32], strides = [1, 1]} : vector<1x44xf32> to vector<1x32xf32>
    %7 = vector.extract_strided_slice %4 {offsets = [0, 4], sizes = [1, 32], strides = [1, 1]} : vector<1x44xf32> to vector<1x32xf32>
    %8 = vector.extract_strided_slice %4 {offsets = [0, 6], sizes = [1, 32], strides = [1, 1]} : vector<1x44xf32> to vector<1x32xf32>
    %9 = vector.extract_strided_slice %4 {offsets = [0, 8], sizes = [1, 32], strides = [1, 1]} : vector<1x44xf32> to vector<1x32xf32>
    %10 = vector.extract_strided_slice %4 {offsets = [0, 10], sizes = [1, 32], strides = [1, 1]} : vector<1x44xf32> to vector<1x32xf32>
    %11 = vector.extract_strided_slice %4 {offsets = [0, 12], sizes = [1, 32], strides = [1, 1]} : vector<1x44xf32> to vector<1x32xf32>
    %12 = tpu.concatenate %5, %6, %7, %8, %9, %10, %11 in 0 : vector<1x32xf32>, vector<1x32xf32>, vector<1x32xf32>, vector<1x32xf32>, vector<1x32xf32>, vector<1x32xf32>, vector<1x32xf32> -> vector<7x32xf32>
    %c0_6 = arith.constant 0 : index
    %c0_7 = arith.constant 0 : index
    %13 = vector.load %arg1[%c0_6, %c0_7] : memref<2x7xf32, #tpu.memory_space<vmem>>, vector<2x7xf32>
    %cst = arith.constant dense<0.000000e+00> : vector<2x32xf32>
    %14 = tpu.matmul %13, %12, %cst {dimension_numbers = #tpu.dot_dimension_numbers<[1], [0], [0], [1], [0, 0, 1, 1], [], []>} : vector<2x7xf32>, vector<7x32xf32>, vector<2x32xf32> -> vector<2x32xf32>
    %15 = vector.broadcast %0 : vector<2x1xf32> to vector<2x32xf32>
    %16 = arith.addf %14, %15 : vector<2x32xf32>
    %cst_8 = arith.constant dense<0.000000e+00> : vector<2xf32>
    %17 = vector.multi_reduction <add>, %16, %cst_8 [1] : vector<2x32xf32> to vector<2xf32>
    %18 = vector.shape_cast %17 : vector<2xf32> to vector<2x1xf32>
    %cst_9 = arith.constant 3.125000e-02 : f32
    %19 = vector.broadcast %cst_9 : f32 to vector<2x1xf32>
    %20 = arith.mulf %18, %19 : vector<2x1xf32>
    %21 = vector.broadcast %20 : vector<2x1xf32> to vector<2x32xf32>
    %22 = arith.subf %16, %21 : vector<2x32xf32>
    %23 = arith.mulf %22, %22 : vector<2x32xf32>
    %cst_10 = arith.constant dense<0.000000e+00> : vector<2xf32>
    %24 = vector.multi_reduction <add>, %23, %cst_10 [1] : vector<2x32xf32> to vector<2xf32>
    %25 = vector.shape_cast %24 : vector<2xf32> to vector<2x1xf32>
    %cst_11 = arith.constant 3.125000e-02 : f32
    %26 = vector.broadcast %cst_11 : f32 to vector<2x1xf32>
    %27 = arith.mulf %25, %26 : vector<2x1xf32>
    %cst_12 = arith.constant 9.99999974E-6 : f32
    %28 = vector.broadcast %cst_12 : f32 to vector<2x1xf32>
    %29 = arith.addf %27, %28 : vector<2x1xf32>
    %30 = math.rsqrt %29 : vector<2x1xf32>
    %31 = vector.broadcast %30 : vector<2x1xf32> to vector<2x32xf32>
    %32 = arith.mulf %22, %31 : vector<2x32xf32>
    %33 = vector.broadcast %2 : vector<2x1xf32> to vector<2x32xf32>
    %34 = arith.mulf %32, %33 : vector<2x32xf32>
    %35 = vector.broadcast %3 : vector<2x1xf32> to vector<2x32xf32>
    %36 = arith.addf %34, %35 : vector<2x32xf32>
    %cst_13 = arith.constant 0.000000e+00 : f32
    %37 = vector.broadcast %cst_13 : f32 to vector<2x32xf32>
    %38 = arith.maximumf %36, %37 : vector<2x32xf32>
    %39 = arith.truncf %38 : vector<2x32xf32> to vector<2x32xbf16>
    %cst_14 = arith.constant 0.000000e+00 : bf16
    %40 = vector.broadcast %cst_14 : bf16 to vector<2x2xbf16>
    %41 = tpu.concatenate %39, %40 in 1 : vector<2x32xbf16>, vector<2x2xbf16> -> vector<2x34xbf16>
    %cst_15 = arith.constant 0.000000e+00 : bf16
    %42 = vector.broadcast %cst_15 : bf16 to vector<2x2xbf16>
    %43 = tpu.concatenate %42, %39 in 1 : vector<2x2xbf16>, vector<2x32xbf16> -> vector<2x34xbf16>
    %44 = tpu.concatenate %41, %43 in 0 : vector<2x34xbf16>, vector<2x34xbf16> -> vector<4x34xbf16>
    %c0_16 = arith.constant 0 : index
    %c0_17 = arith.constant 0 : index
    %45 = vector.load %arg2[%c0_16, %c0_17] : memref<8x4xbf16, #tpu.memory_space<vmem>>, vector<8x4xbf16>
    %cst_18 = arith.constant dense<0.000000e+00> : vector<8x34xf32>
    %46 = tpu.matmul %45, %44, %cst_18 {dimension_numbers = #tpu.dot_dimension_numbers<[1], [0], [0], [1], [0, 0, 1, 1], [], []>} : vector<8x4xbf16>, vector<4x34xbf16>, vector<8x34xf32> -> vector<8x34xf32>
    %47 = tpu.concatenate %1, %1, %1, %1 in 0 : vector<2x1xf32>, vector<2x1xf32>, vector<2x1xf32>, vector<2x1xf32> -> vector<8x1xf32>
    %48 = vector.broadcast %47 : vector<8x1xf32> to vector<8x34xf32>
    %49 = arith.addf %46, %48 : vector<8x34xf32>
    %50 = tpu.iota {dimensions = array<i32: 1>} : vector<8x34xi32>
    %51 = tpu.iota {dimensions = array<i32: 0>} : vector<8x34xi32>
    %c32_i32 = arith.constant 32 : i32
    %52 = vector.broadcast %c32_i32 : i32 to vector<8x34xi32>
    %53 = arith.cmpi sge, %50, %52 : vector<8x34xi32>
    %c6_i32 = arith.constant 6 : i32
    %54 = vector.broadcast %c6_i32 : i32 to vector<8x34xi32>
    %55 = arith.cmpi sge, %51, %54 : vector<8x34xi32>
    %56 = arith.andi %53, %55 : vector<8x34xi1>
    %cst_19 = arith.constant 0.000000e+00 : f32
    %cst_20 = arith.constant 1.000000e+00 : f32
    %57 = vector.broadcast %cst_19 : f32 to vector<8x34xf32>
    %58 = vector.broadcast %cst_20 : f32 to vector<8x34xf32>
    %59 = arith.select %56, %57, %58 : vector<8x34xi1>, vector<8x34xf32>
    %60 = arith.mulf %49, %59 : vector<8x34xf32>
    %61 = vector.extract_strided_slice %60 {offsets = [0, 0], sizes = [2, 34], strides = [1, 1]} : vector<8x34xf32> to vector<2x34xf32>
    %62 = vector.extract_strided_slice %60 {offsets = [2, 0], sizes = [2, 34], strides = [1, 1]} : vector<8x34xf32> to vector<2x34xf32>
    %63 = arith.addf %61, %62 : vector<2x34xf32>
    %64 = vector.extract_strided_slice %60 {offsets = [4, 0], sizes = [2, 34], strides = [1, 1]} : vector<8x34xf32> to vector<2x34xf32>
    %65 = arith.addf %63, %64 : vector<2x34xf32>
    %66 = vector.extract_strided_slice %60 {offsets = [6, 0], sizes = [2, 34], strides = [1, 1]} : vector<8x34xf32> to vector<2x34xf32>
    %67 = arith.addf %65, %66 : vector<2x34xf32>
    %cst_21 = arith.constant dense<0.000000e+00> : vector<2xf32>
    %68 = vector.multi_reduction <add>, %67, %cst_21 [1] : vector<2x34xf32> to vector<2xf32>
    %69 = vector.shape_cast %68 : vector<2xf32> to vector<2x1xf32>
    %cst_22 = arith.constant 0.00746268639 : f32
    %70 = vector.broadcast %cst_22 : f32 to vector<2x1xf32>
    %71 = arith.mulf %69, %70 : vector<2x1xf32>
    %72 = tpu.concatenate %71, %71, %71, %71 in 0 : vector<2x1xf32>, vector<2x1xf32>, vector<2x1xf32>, vector<2x1xf32> -> vector<8x1xf32>
    %73 = vector.broadcast %72 : vector<8x1xf32> to vector<8x34xf32>
    %74 = arith.subf %49, %73 : vector<8x34xf32>
    %75 = arith.mulf %74, %59 : vector<8x34xf32>
    %76 = vector.extract_strided_slice %75 {offsets = [0, 0], sizes = [2, 34], strides = [1, 1]} : vector<8x34xf32> to vector<2x34xf32>
    %77 = vector.extract_strided_slice %75 {offsets = [0, 0], sizes = [2, 34], strides = [1, 1]} : vector<8x34xf32> to vector<2x34xf32>
    %78 = arith.mulf %76, %77 : vector<2x34xf32>
    %79 = vector.extract_strided_slice %75 {offsets = [2, 0], sizes = [2, 34], strides = [1, 1]} : vector<8x34xf32> to vector<2x34xf32>
    %80 = arith.mulf %79, %79 : vector<2x34xf32>
    %81 = arith.addf %78, %80 : vector<2x34xf32>
    %82 = vector.extract_strided_slice %75 {offsets = [4, 0], sizes = [2, 34], strides = [1, 1]} : vector<8x34xf32> to vector<2x34xf32>
    %83 = arith.mulf %82, %82 : vector<2x34xf32>
    %84 = arith.addf %81, %83 : vector<2x34xf32>
    %85 = vector.extract_strided_slice %75 {offsets = [6, 0], sizes = [2, 34], strides = [1, 1]} : vector<8x34xf32> to vector<2x34xf32>
    %86 = arith.mulf %85, %85 : vector<2x34xf32>
    %87 = arith.addf %84, %86 : vector<2x34xf32>
    %cst_23 = arith.constant dense<0.000000e+00> : vector<2xf32>
    %88 = vector.multi_reduction <add>, %87, %cst_23 [1] : vector<2x34xf32> to vector<2xf32>
    %89 = vector.shape_cast %88 : vector<2xf32> to vector<2x1xf32>
    %cst_24 = arith.constant 0.00746268639 : f32
    %90 = vector.broadcast %cst_24 : f32 to vector<2x1xf32>
    %91 = arith.mulf %89, %90 : vector<2x1xf32>
    %cst_25 = arith.constant 9.99999974E-6 : f32
    %92 = vector.broadcast %cst_25 : f32 to vector<2x1xf32>
    %93 = arith.addf %91, %92 : vector<2x1xf32>
    %94 = math.rsqrt %93 : vector<2x1xf32>
    %95 = arith.mulf %94, %2 : vector<2x1xf32>
    %96 = tpu.concatenate %95, %95, %95, %95 in 0 : vector<2x1xf32>, vector<2x1xf32>, vector<2x1xf32>, vector<2x1xf32> -> vector<8x1xf32>
    %97 = tpu.concatenate %3, %3, %3, %3 in 0 : vector<2x1xf32>, vector<2x1xf32>, vector<2x1xf32>, vector<2x1xf32> -> vector<8x1xf32>
    %98 = vector.broadcast %72 : vector<8x1xf32> to vector<8x34xf32>
    %99 = arith.subf %49, %98 : vector<8x34xf32>
    %100 = vector.broadcast %96 : vector<8x1xf32> to vector<8x34xf32>
    %101 = arith.mulf %99, %100 : vector<8x34xf32>
    %102 = vector.broadcast %97 : vector<8x1xf32> to vector<8x34xf32>
    %103 = arith.addf %101, %102 : vector<8x34xf32>
    %cst_26 = arith.constant 0.000000e+00 : f32
    %104 = vector.broadcast %cst_26 : f32 to vector<8x34xf32>
    %105 = arith.maximumf %103, %104 : vector<8x34xf32>
    %cst_27 = arith.constant 0.000000e+00 : f32
    %106 = vector.broadcast %cst_27 : f32 to vector<8x94xf32>
    %107 = tpu.concatenate %105, %106 in 1 : vector<8x34xf32>, vector<8x94xf32> -> vector<8x128xf32>
    %c0_28 = arith.constant 0 : index
    %c0_29 = arith.constant 0 : index
    %108 = vector.load %arg4[%c0_28, %c0_29] : memref<8x128xf32, #tpu.memory_space<vmem>>, vector<8x128xf32>
    tpu.vector_store %arg4[%c0_28, %c0_29], %107 {strides = array<i32>} : memref<8x128xf32, #tpu.memory_space<vmem>>, vector<8x128xf32>,
    return
  }
}

</mosaic_0001>

<bundles_post_ra>
// kernel: conv_then_deconv_then_concat.1
= control target key start
LH: loop header
LB: loop body
LE: loop exit
PB: predicated region body
PF: predicated region fallthrough
CT: control target
= control target key end

     0   :  { %v21_v0 = vlaneseq  ;;  %v372_v4 = vmov 0.0   ;;  %vm373_vm0 = vmmov 0   ;;  %v374_v6 = vmov 0   ;;  %s375_s17 = smov 126   ;;  %s376_s18 = smov 122   ;;  %s466_s0 = inlined_call_operand.vmem [shape: f32[1,44], index: 0, kind: input, shape index: {}]   ;;  %s467_s3 = inlined_call_operand.vmem [shape: f32[2,4], index: 3, kind: input, shape index: {}]   ;;  %s468_s1 = inlined_call_operand.vmem [shape: f32[2,7], index: 1, kind: input, shape index: {}]   ;;  %s469_s2 = inlined_call_operand.vmem [shape: bf16[8,4], index: 2, kind: input, shape index: {}]   ;;  %s470_s4 = inlined_call_operand.vmem [shape: f32[8,128], index: 4, kind: output, shape index: {}]  }
   0x1   :  { %v19_v2 = vld [vmem:[%s466_s0] sm:$0x1]  ;;  %335 = vmatprep.subr.mxu0 %v372_v4  ;;  %340 = vmatprep.subr.bf16.mxu1 %v372_v4  ;;  %s377_s19 = smov 124   ;;  %s378_s20 = smov 120   ;;  %vm43_vm1 = vcmask 1040384   ;;  %vm45_vm2 = vcmask 1041408  }
   0x2   :  { %v412_v1 = vshrl.u32 %v21_v0, 7  ;;  %337 = vmatprep.mubr.msk.f32.mxu0 %vm373_vm0, %v372_v4  ;;  %342 = vmatprep.mubr.msk.bf16.mxu1 %vm373_vm0, %v372_v4  ;;  %s379_s0 = smov 118   ;;  %s380_s21 = smov 116   ;;  %v421_v7 = vld [vmem:[%s467_s3] sm:$0x3]  ;;  %vm47_vm3 = vcmask 1042432  }
   0x3   :  { %360 = vset.pattern.permute.xlu0 %v374_v6  ;;  %vm49_vm4 = vcmask 1043456   ;;  %vm51_vm5 = vcmask 1044480   ;;  %vm53_vm6 = vcmask 1045504   ;;  %vm65_vm7 = vcmask 1046528   ;;  %v55_v19 = vld [vmem:[%s468_s1] sm:$0x3] }
   0x4   :  { %v23_v3 = vsub.s32 0, %v412_v1  ;;  %vm61_vm8 = vcmask 56320   ;;  %vm139_vm9 = vcmask 254976   ;;  %v381_v26 = vmov 2   ;;  %s384_s1 = smov 2  }
   0x5   :  { %361 = vset.pattern.permute.xlu1 %v381_v26  ;;  %v382_v27 = vmov 3   ;;  %v180_v42 = vrot.slane %v421_v7, 6  ;;  %v182_v43 = vrot.slane %v421_v7, 4  ;;  %v383_v45 = vmov 1   ;;  %v179_v57 = vld [vmem:[%s469_s2] sm:$0xf] }
   0x6   :  { %v24_v5 = vrot.slane %v19_v2, %v23_v3  ;;  %v184_v46 = vrot.slane %v421_v7, 2  ;;  %vm172_vm10 = vcmask 15360   ;;  %vm165_vm11 = vcmask 261120  }
   0x7   :  { %v186_v47 = vsel %vm45_vm2, %v421_v7, %v180_v42  ;;  %vm194_vm12 = vcmask 31744   ;;  %v241_v58 = vand.u32 127, %v21_v0  ;;  %vm245_vm14 = vcmp.ge.s32.totalorder %v412_v1, 6 }
   0x8   :  { %25 = vrot.lane.b32.xlu0 %v24_v5, %s375_s17  ;;  %31 = vrot.lane.b32.xlu1 %v24_v5, %s376_s18  ;;  %v187_v49 = vsel %vm49_vm4, %v186_v47, %v182_v43  ;;  %v385_v61 = vmov 1.0   ;;  %vm259_vm0 = vcmask 271360  }
   0x9   :  { %v441_v50 = vsel %vm53_vm6, %v187_v49, %v184_v46  ;;  %vm244_vm13 = vcmp.ge.s32.totalorder %v241_v58, 32 }
   0xa   :  { %vm246_vm15 = vmand %vm244_vm13, %vm245_vm14 }
   0xb   :  { %v247_v62 = vsel %vm246_vm15, 0.0, %v385_v61 }
   0xc   :  { %28 = vrot.lane.b32.xlu0 %v24_v5, %s377_s19  ;;  %34 = vrot.lane.b32.xlu1 %v24_v5, %s378_s20 }
  0x10   :  { %37 = vrot.lane.b32.xlu0 %v24_v5, %s379_s0  ;;  %40 = vrot.lane.b32.xlu1 %v24_v5, %s380_s21 }
  0x14   :  { %58 = vperm.xlu0 %360, %v421_v7  }
  0x18   :  { %362 = vset.pattern.permute.xlu0 %v382_v27 }
  0x7a   :  { %v26_v8 = vpop.permute.xlu0 %25  ;;  %v32_v9 = vpop.permute.xlu1 %31 }
  0x7b   :  { %v44_v10 = vsel %vm43_vm1, %v19_v2, %v26_v8 }
  0x7e   :  { %v29_v11 = vpop.permute.xlu0 %28  ;;  %v35_v12 = vpop.permute.xlu1 %34 }
  0x7f   :  { %v46_v13 = vsel %vm45_vm2, %v44_v10, %v29_v11 }
  0x80   :  { %v48_v14 = vsel %vm47_vm3, %v46_v13, %v32_v9 }
  0x81   :  { %v50_v15 = vsel %vm49_vm4, %v48_v14, %v35_v12 }
  0x82   :  { %v38_v16 = vpop.permute.xlu0 %37  ;;  %v41_v17 = vpop.permute.xlu1 %40 }
  0x83   :  { %v52_v18 = vsel %vm51_vm5, %v50_v15, %v38_v16 }
  0x84   :  { %v54_v20 = vsel %vm53_vm6, %v52_v18, %v41_v17 }
  0x85   :  { %336 = vmatpush3.msk.msra.mxu0 %vm65_vm7, %v54_v20 }
  0x86   :  { %338 = vmatmul.mubr.msk.f32.vlgmr.msra.gmra.mrb[0].mxu0 %vm61_vm8, %v55_v19 }
  0x93   :  { %v59_v21 = vpop.permute.xlu0 %58 }
 0x159   :  { %v135_v22 = vpop.f32.mrb[0].mxu0 }
 0x15a   :  { %v136_v23 = vadd.f32 %v135_v22, %v59_v21  ;;  %v339_v24 = vpop.f32.mrb[1].mxu0 }
 0x15c   :  { %v140_v25 = vsel %vm139_vm9, %v136_v23, 0.0 }
 0x15d   :  { %141 = vadd.xlane.f32.xlu1 %v140_v25 }
 0x16e   :  { %154 = vperm.xlu1 %361, %v421_v7  }
 0x172   :  { %363 = vset.pattern.permute.xlu1 %v383_v45 }
 0x1ea   :  { %v142_v28 = vpop.xlane.xlu1 %141 }
 0x1eb   :  { %v143_v29 = vmul.f32 0.03125, %v142_v28 }
 0x1ed   :  { %v144_v30 = vsub.f32 %v136_v23, %v143_v29 }
 0x1ee   :  { %v155_v37 = vpop.permute.xlu1 %154 }
 0x1ef   :  { %v145_v31 = vmul.f32 %v144_v30, %v144_v30 }
 0x1f1   :  { %v146_v32 = vsel %vm139_vm9, %v145_v31, 0.0 }
 0x1f2   :  { %147 = vadd.xlane.f32.xlu0 %v146_v32 }
 0x208   :  { %159 = vperm.xlu0 %362, %v421_v7  }
 0x20c   :  { %364 = vset.pattern.permute.xlu0 %v374_v6 }
 0x27f   :  { %v148_v33 = vpop.xlane.xlu0 %147 }
 0x280   :  { %v149_v34 = vmul.f32 0.03125, %v148_v33 }
 0x282   :  { %v150_v35 = vadd.f32 1e-05, %v149_v34 }
 0x284   :  { %368 = vrsqrt.f32 %v150_v35 }
 0x287   :  { %v160_v39 = vpop.permute.xlu0 %159 }
 0x28e   :  { %v369_v36 = vpop.eup %368 }
 0x28f   :  { %v152_v38 = vmul.f32 %v369_v36, %v144_v30 }
 0x291   :  { %v157_v40 = vmul.f32 %v155_v37, %v152_v38 }
 0x293   :  { %v162_v41 = vadd.f32 %v160_v39, %v157_v40 }
 0x295   :  { %v163_v44 = vmax.f32 %v162_v41, 0.0 }
 0x297   :  { %v164_v48 = vpack.c.bf16 %v163_v44, %v163_v44 }
 0x299   :  { %170 = vrot.lane.b32.xlu1 %v164_v48, %s384_s1  ;;  %v168_v54 = vsel %vm165_vm11, %v164_v48, 0 }
 0x29d   :  { %191 = vperm.xlu1 %363, %v441_v50  }
 0x2a1   :  { %365 = vset.pattern.permute.xlu1 %v381_v26 }
 0x30b   :  { %v171_v51 = vpop.permute.xlu1 %170 }
 0x30c   :  { %v174_v52 = vsel %vm172_vm10, 0, %v171_v51 }
 0x30d   :  { %v176_v53 = vrot.slane %v174_v52, 7 }
 0x30f   :  { %v178_v55 = vsel %vm43_vm1, %v168_v54, %v176_v53  ;;  %vm321_vm1 = vcmask 277504  }
 0x310   :  { %v198_v56 = vsel %vm45_vm2, %v178_v55, 0 }
 0x311   :  { %341 = vmatpush3.bf16.msra.mxu1 %v198_v56 }
 0x314   :  { %343 = vmatmul.mubr.msk.bf16.vlgmr.msra.gmra.mrb[0].mxu1 %vm194_vm12, %v179_v57 }
 0x31c   :  { %v192_v59 = vpop.permute.xlu1 %191 }
 0x3e7   :  { %v234_v60 = vpop.f32.mrb[0].mxu1 }
 0x3e8   :  { %v235_v63 = vadd.f32 %v234_v60, %v192_v59  ;;  %v344_v2 = vpop.f32.mrb[1].mxu1 }
 0x3e9   :  { %v237_v3 = vpop.f32.mrb[2].mxu1 }
 0x3ea   :  { %v248_v4 = vmul.f32 %v247_v62, %v235_v63  ;;  %v345_v5 = vpop.f32.mrb[3].mxu1 }
 0x3ec   :  { %v250_v6 = vrot.slane %v248_v4, 2  ;;  %v253_v9 = vrot.slane %v248_v4, 4  ;;  %v256_v11 = vrot.slane %v248_v4, 6 }
 0x3ee   :  { %v252_v8 = vadd.f32 %v250_v6, %v248_v4 }
 0x3f0   :  { %v255_v10 = vadd.f32 %v253_v9, %v252_v8 }
 0x3f2   :  { %v258_v0 = vadd.f32 %v256_v11, %v255_v10 }
 0x3f4   :  { %v260_v12 = vsel %vm259_vm0, %v258_v0, 0.0 }
 0x3f5   :  { %261 = vadd.xlane.f32.xlu1 %v260_v12 }
 0x482   :  { %v262_v1 = vpop.xlane.xlu1 %261 }
 0x483   :  { %v263_v13 = vmul.f32 0.0074626864, %v262_v1 }
 0x485   :  { %v265_v14 = vrot.slane %v263_v13, 6  ;;  %v267_v15 = vrot.slane %v263_v13, 4  ;;  %v269_v16 = vrot.slane %v263_v13, 2 }
 0x487   :  { %v271_v17 = vsel %vm45_vm2, %v263_v13, %v265_v14 }
 0x488   :  { %v272_v18 = vsel %vm49_vm4, %v271_v17, %v267_v15 }
 0x489   :  { %v273_v19 = vsel %vm53_vm6, %v272_v18, %v269_v16 }
 0x48a   :  { %276 = vperm.xlu0 %364, %v273_v19  }
 0x48e   :  { %367 = vset.pattern.permute.xlu0 %v382_v27 }
 0x509   :  { %v277_v20 = vpop.permute.xlu0 %276 }
 0x50a   :  { %v279_v21 = vsub.f32 %v235_v63, %v277_v20 }
 0x50c   :  { %v280_v22 = vmul.f32 %v279_v21, %v247_v62 }
 0x50e   :  { %v281_v23 = vmul.f32 %v280_v22, %v280_v22 }
 0x510   :  { %v283_v24 = vrot.slane %v281_v23, 2  ;;  %v286_v26 = vrot.slane %v281_v23, 4  ;;  %v289_v29 = vrot.slane %v281_v23, 6 }
 0x512   :  { %v285_v25 = vadd.f32 %v283_v24, %v281_v23 }
 0x514   :  { %v288_v28 = vadd.f32 %v286_v26, %v285_v25 }
 0x516   :  { %v291_v30 = vadd.f32 %v289_v29, %v288_v28 }
 0x518   :  { %v292_v31 = vsel %vm259_vm0, %v291_v30, 0.0 }
 0x519   :  { %293 = vadd.xlane.f32.xlu0 %v292_v31 }
 0x5a6   :  { %v294_v32 = vpop.xlane.xlu0 %293 }
 0x5a7   :  { %v295_v33 = vmul.f32 0.0074626864, %v294_v32 }
 0x5a9   :  { %v296_v34 = vadd.f32 1e-05, %v295_v33 }
 0x5ab   :  { %370 = vrsqrt.f32 %v296_v34 }
 0x5b5   :  { %v371_v35 = vpop.eup %370 }
 0x5b6   :  { %v298_v36 = vmul.f32 %v371_v35, %v421_v7 }
 0x5b8   :  { %v300_v37 = vrot.slane %v298_v36, 6  ;;  %v302_v38 = vrot.slane %v298_v36, 4  ;;  %v304_v39 = vrot.slane %v298_v36, 2 }
 0x5ba   :  { %v306_v40 = vsel %vm45_vm2, %v298_v36, %v300_v37 }
 0x5bb   :  { %v307_v41 = vsel %vm49_vm4, %v306_v40, %v302_v38 }
 0x5bc   :  { %v308_v42 = vsel %vm53_vm6, %v307_v41, %v304_v39 }
 0x5bd   :  { %311 = vperm.xlu1 %365, %v308_v42  }
 0x5c1   :  { %366 = vset.pattern.permute.xlu1 %v382_v27 }
 0x5c2   :  { %316 = vperm.xlu1 %366, %v441_v50  }
 0x63c   :  { %v312_v43 = vpop.permute.xlu1 %311 }
 0x63d   :  { %v314_v44 = vmul.f32 %v312_v43, %v279_v21 }
 0x641   :  { %v317_v45 = vpop.permute.xlu1 %316 }
 0x642   :  { %v319_v46 = vadd.f32 %v317_v45, %v314_v44 }
 0x644   :  { %v320_v7 = vmax.f32 %v319_v46, 0.0 }
 0x646   :  { %v322_v47 = vsel %vm321_vm1, %v320_v7, 0.0 }
 0x647   :  { %323 = vst [vmem:[%s470_s4] sm:$0xff] %v322_v47 }

</bundles_post_ra>
